<compile_context>
chip_gen: v7x
topology: tpu7x:2x2x1
jax: 0.10.0
libtpu: 0.0.40
codegen_flags: <defaults>
</compile_context>

<pallas_src>
import jax
import jax.numpy as jnp
from jax.experimental import pallas as pl
from jax.experimental.pallas import tpu as pltpu


def _round_up(v, m):
    return (v + m - 1) // m * m


def pad_fourier_matrix(B):
    """Pad the mapping dim of B up to a multiple of 128.

    Call once at parameter-init time and store the padded matrix, so the
    forward pass never re-pads (no per-call HBM op / fusion barrier)."""
    C, M = B.shape
    M_pad = _round_up(M, 128)
    if M_pad != M:
        B = jnp.pad(B, ((0, 0), (0, M_pad - M)))
    return B


def _gfft_fma_kernel(x_ref, b_ref, o_ref):
    """VPU path for tiny contraction dims (C<=8).

    C broadcast multiply-adds then sin, all f32.  x columns are sliced from
    the ref one at a time so no (row_block, C) value (row_block/8 nearly-empty
    vregs) is ever live."""
    C = x_ref.shape[1]
    b = b_ref[...].astype(jnp.float32)                      # (C, M_pad), tiny
    acc = x_ref[:, 0:1].astype(jnp.float32) * b[0:1, :]     # (rows, M_pad)
    for c in range(1, C):                                    # unrolled, C small
        acc = acc + x_ref[:, c:c + 1].astype(jnp.float32) * b[c:c + 1, :]
    o_ref[...] = jnp.sin(acc).astype(o_ref.dtype)


def _gfft_mxu_kernel(x_ref, b_ref, o_ref):
    """MXU path for larger contraction dims."""
    acc = jnp.dot(x_ref[...], b_ref[...], preferred_element_type=jnp.float32)
    o_ref[...] = jnp.sin(acc).astype(o_ref.dtype)


def gaussian_fourier_feature_transform(
    x,
    B,
    *,
    mapping_size=None,
    small_n_threshold=1024,
    max_row_block=8192,
    min_row_block=512,
    unpad=True,
):
    """x: (1, N, C) or (N, C); B: (C, M) or lane-padded (C, 128*k).

    Returns sin(x @ B[:, :mapping_size]) of shape (N, mapping_size)
    (or the lane-padded (N, 128*k) array if unpad=False)."""
    if x.ndim == 3:
        # torch: x = x.squeeze(0); assert 2-D
        assert x.shape[0] == 1, "expected leading batch dim of size 1"
        x = x[0]
    assert x.ndim == 2, f"Expected 2D input (got {x.ndim}D input)"
    N, C = x.shape
    Cb, M_stored = B.shape
    assert C == Cb
    M = M_stored if mapping_size is None else mapping_size
    assert M <= M_stored
    out_dtype = x.dtype

    # Lane-dense output width.  B should already be padded (pad_fourier_matrix
    # at init); pad here only as a correctness fallback.
    M_pad = _round_up(M_stored, 128)
    if M_pad != M_stored:
        B = jnp.pad(B, ((0, 0), (0, M_pad - M_stored)))

    kernel = _gfft_fma_kernel if C <= 8 else _gfft_mxu_kernel

    if N <= small_n_threshold:
        # Tiny N (e.g. the module's N=8 use): single shot, no grid, whole
        # arrays resident in VMEM.  (For production-tiny shapes a plain XLA
        # jnp.sin(x @ B) fused with neighbors is at least as fast; the Pallas
        # path is kept so the kernel itself is exercised here.)
        out = pl.pallas_call(
            kernel,
            out_shape=jax.ShapeDtypeStruct((N, M_pad), out_dtype),
            in_specs=[
                pl.BlockSpec(memory_space=pltpu.MemorySpace.VMEM),
                pl.BlockSpec(memory_space=pltpu.MemorySpace.VMEM),
            ],
            out_specs=pl.BlockSpec(memory_space=pltpu.MemorySpace.VMEM),
        )(x, B)
    else:
        # Large N: tile only the row axis, B (tiny) stays resident.
        # Row block: multiple of the sublane quantum, >= min_row_block to
        # amortize per-step overhead, <= max_row_block for VMEM, and capped so
        # the grid has >= ~4 steps (keeps both v7x TensorCores fed via the
        # "parallel" axis).  8192 x 128 x 4 B x 2 buffers = 8 MiB -> fits the
        # scoped-VMEM default on all generations.
        sublane = 16 if x.dtype == jnp.bfloat16 else 8
        row_block = min(max_row_block, _round_up(pl.cdiv(N, 4), sublane))
        row_block = max(_round_up(min_row_block, sublane), row_block)
        assert row_block % sublane == 0, "row_block must respect (8,128) tiling"
        assert M_pad % 128 == 0

        # No wrapper-side row padding: Pallas masks the ragged last block.
        out = pl.pallas_call(
            kernel,
            out_shape=jax.ShapeDtypeStruct((N, M_pad), out_dtype),
            grid=(pl.cdiv(N, row_block),),
            in_specs=[
                pl.BlockSpec((row_block, C), lambda i: (i, 0)),
                pl.BlockSpec((C, M_pad), lambda i: (0, 0)),   # resident
            ],
            out_specs=pl.BlockSpec((row_block, M_pad), lambda i: (i, 0)),
            compiler_params=pltpu.CompilerParams(
                dimension_semantics=("parallel",)   # shards across TCs on v7x
            ),
        )(x, B)

    if unpad and M_pad != M:
        # Kept for module-faithful output shape; cheap when consumed inside
        # the same jit.  Pass unpad=False to keep features lane-padded.
        out = out[:, :M]
    return out


if __name__ == "__main__":
    # Module hyper-params (small, consistent with the forward pass):
    num_input_channels = 4
    mapping_size = 93
    scale = 25.0
    N = 8  # number of points / rows

    key = jax.random.PRNGKey(0)
    k_b, k_x, k_x2 = jax.random.split(key, 3)

    # Deterministic "parameter" init: B = randn(C, mapping_size) * scale,
    # lane-padded ONCE at init time (stored padded).
    B_raw = jax.random.normal(
        k_b, (num_input_channels, mapping_size), dtype=jnp.float32) * scale
    B = pad_fourier_matrix(B_raw)

    # Input with the leading batch dim that gets squeezed, as in the module.
    x = jax.random.normal(k_x, (1, N, num_input_channels), dtype=jnp.float32)

    out = gaussian_fourier_feature_transform(x, B, mapping_size=mapping_size)
    out = jax.block_until_ready(out)

    # Reference.  scale=25 makes the sin arguments O(100), so f32 summation-
    # order differences of a few ulps in the argument show up as ~1e-4 at the
    # sin output; compare against an exact-f32 matmul with a matching tolerance.
    def ref_fn(x2d):
        arg = jnp.einsum("nc,cm->nm", x2d, B_raw,
                         precision=jax.lax.Precision.HIGHEST)
        return jnp.sin(arg)

    ref = ref_fn(x[0])
    assert out.shape == (N, mapping_size)
    assert jnp.allclose(out, ref, atol=1e-4, rtol=1e-4)

    # Also exercise the row-tiled path: N larger than the small-N threshold
    # and not a multiple of the auto-chosen row block, covering the ragged
    # last block (masked store), resident B and the parallel grid axis.
    N2 = 2056
    x2 = jax.random.normal(
        k_x2, (1, N2, num_input_channels), dtype=jnp.float32)
    out2 = jax.block_until_ready(
        gaussian_fourier_feature_transform(x2, B, mapping_size=mapping_size))
    ref2 = ref_fn(x2[0])
    assert out2.shape == (N2, mapping_size)
    assert jnp.allclose(out2, ref2, atol=1e-4, rtol=1e-4)

    print("KERNEL_OK")
</pallas_src>

<mosaic_0001>
module attributes {stable_mosaic.version = 11 : i64} {
  func.func @_gfft_fma_kernel(%arg0: memref<8x4xf32, #tpu.memory_space<vmem>>, %arg1: memref<4x128xf32, #tpu.memory_space<vmem>>, %arg2: memref<8x128xf32, #tpu.memory_space<vmem>>) attributes {dimension_semantics = [], scalar_prefetch = 0 : i64, scratch_operands = 0 : i64, tpu.core_type = #tpu.core_type<tc>} {
    %c0 = arith.constant 0 : index
    %c0_0 = arith.constant 0 : index
    %0 = vector.load %arg1[%c0, %c0_0] : memref<4x128xf32, #tpu.memory_space<vmem>>, vector<4x128xf32>
    %c0_1 = arith.constant 0 : index
    %c0_2 = arith.constant 0 : index
    %1 = vector.load %arg0[%c0_1, %c0_2] : memref<8x4xf32, #tpu.memory_space<vmem>>, vector<8x1xf32>
    %2 = vector.extract_strided_slice %0 {offsets = [0, 0], sizes = [1, 128], strides = [1, 1]} : vector<4x128xf32> to vector<1x128xf32>
    %3 = vector.broadcast %1 : vector<8x1xf32> to vector<8x128xf32>
    %4 = vector.broadcast %2 : vector<1x128xf32> to vector<8x128xf32>
    %5 = arith.mulf %3, %4 : vector<8x128xf32>
    %c0_3 = arith.constant 0 : index
    %c1 = arith.constant 1 : index
    %6 = vector.load %arg0[%c0_3, %c1] : memref<8x4xf32, #tpu.memory_space<vmem>>, vector<8x1xf32>
    %7 = vector.extract_strided_slice %0 {offsets = [1, 0], sizes = [1, 128], strides = [1, 1]} : vector<4x128xf32> to vector<1x128xf32>
    %8 = vector.broadcast %6 : vector<8x1xf32> to vector<8x128xf32>
    %9 = vector.broadcast %7 : vector<1x128xf32> to vector<8x128xf32>
    %10 = arith.mulf %8, %9 : vector<8x128xf32>
    %11 = arith.addf %5, %10 : vector<8x128xf32>
    %c0_4 = arith.constant 0 : index
    %c2 = arith.constant 2 : index
    %12 = vector.load %arg0[%c0_4, %c2] : memref<8x4xf32, #tpu.memory_space<vmem>>, vector<8x1xf32>
    %13 = vector.extract_strided_slice %0 {offsets = [2, 0], sizes = [1, 128], strides = [1, 1]} : vector<4x128xf32> to vector<1x128xf32>
    %14 = vector.broadcast %12 : vector<8x1xf32> to vector<8x128xf32>
    %15 = vector.broadcast %13 : vector<1x128xf32> to vector<8x128xf32>
    %16 = arith.mulf %14, %15 : vector<8x128xf32>
    %17 = arith.addf %11, %16 : vector<8x128xf32>
    %c0_5 = arith.constant 0 : index
    %c3 = arith.constant 3 : index
    %18 = vector.load %arg0[%c0_5, %c3] : memref<8x4xf32, #tpu.memory_space<vmem>>, vector<8x1xf32>
    %19 = vector.extract_strided_slice %0 {offsets = [3, 0], sizes = [1, 128], strides = [1, 1]} : vector<4x128xf32> to vector<1x128xf32>
    %20 = vector.broadcast %18 : vector<8x1xf32> to vector<8x128xf32>
    %21 = vector.broadcast %19 : vector<1x128xf32> to vector<8x128xf32>
    %22 = arith.mulf %20, %21 : vector<8x128xf32>
    %23 = arith.addf %17, %22 : vector<8x128xf32>
    %24 = math.sin %23 : vector<8x128xf32>
    %c0_6 = arith.constant 0 : index
    %c0_7 = arith.constant 0 : index
    %25 = vector.load %arg2[%c0_6, %c0_7] : memref<8x128xf32, #tpu.memory_space<vmem>>, vector<8x128xf32>
    tpu.vector_store %arg2[%c0_6, %c0_7], %24 {strides = array<i32>} : memref<8x128xf32, #tpu.memory_space<vmem>>, vector<8x128xf32>,
    return
  }
}

</mosaic_0001>

<bundles_post_ra>
// kernel: tpu_custom_call.1
= control target key start
LH: loop header
LB: loop body
LE: loop exit
PB: predicated region body
PF: predicated region fallthrough
CT: control target
= control target key end

     0   :  { %v225_v1 = vmov 0   ;;  %v226_v2 = vmov 2   ;;  %s290_s0 = inlined_call_operand.vmem [shape: f32[8,4], index: 0, kind: input, shape index: {}]   ;;  %s291_s1 = inlined_call_operand.vmem [shape: f32[4,128], index: 1, kind: input, shape index: {}]   ;;  %s292_s2 = inlined_call_operand.hbm [shape: f32[8,128], index: 2, kind: output, shape index: {}]  }
   0x1   :  { %v13_v0 = vld [vmem:[%s290_s0] sm:$0xff]  ;;  %192 = vset.pattern.permute.xlu0 %v225_v1  ;;  %194 = vset.pattern.permute.xlu1 %v226_v2 }
   0x2   :  { %7 = vsyncpa [#allocation3], 0  ;;  %16 = vperm.xlu0 %192, %v13_v0   ;;  %35 = vperm.xlu1 %194, %v13_v0   ;;  %v227_v3 = vmov 1   ;;  %v228_v4 = vmov 3   ;;  %v19_v5 = vlaneseq  ;;  %v12_v9 = vld [vmem:[%s291_s1] sm:$0xf] }
   0x3   :  { %v229_v38 = vmov 2102212464   ;;  %v230_v40 = vmov 920167782   ;;  %v231_v44 = vmov 1326507024  }
   0x4   :  { %v20_v6 = vshrl.u32 %v19_v5, 7  ;;  %v232_v46 = vmov 683565275   ;;  %v233_v48 = vmov 2475754826   ;;  %s235_s1 = smov [#allocation2]  }
   0x5   :  { %v234_v51 = vmov 2131351028   ;;  %s165_s12 = sshll.u32 %s235_s1, 4  ;;  %s166_s12 = int_to_ptr.vmem [resolvable:$true] %s165_s12 }
   0x6   :  { %193 = vset.pattern.permute.xlu0 %v227_v3  ;;  %195 = vset.pattern.permute.xlu1 %v228_v4  ;;  %v21_v7 = vsub.s32 0, %v20_v6  ;;  %v30_v8 = vsub.s32 1, %v20_v6  ;;  %v40_v11 = vsub.s32 2, %v20_v6  ;;  %v50_v13 = vsub.s32 3, %v20_v6  ;;  %s201_s13 = scalar_lea.vmem %s166_s12, 128  ;;  %p206_p1 = scmp.lt.s32.totalorder %s166_s12, %s166_s12 }
   0x7   :  { %25 = vperm.xlu0 %193, %v13_v0   ;;  %45 = vperm.xlu1 %195, %v13_v0   ;;  %p202_p0 = scmp.ne.s32.totalorder %s166_s12, %s201_s13  ;;  %p207_p2 = scmp.lt.s32.totalorder %s201_s13, %s201_s13 }
   0x8   :  { %v22_v14 = vrot.slane %v12_v9, %v21_v7  ;;  %v31_v15 = vrot.slane %v12_v9, %v30_v8  ;;  %v41_v16 = vrot.slane %v12_v9, %v40_v11  ;;  %v51_v17 = vrot.slane %v12_v9, %v50_v13 }
   0x9   :  { %p208_p3 = por %p207_p2, %p206_p1 }
   0xb   :  { %196 = vset.pattern.permute.xlu0 %v228_v4  ;;  %p209_p4 = pnand %p208_p3, %p202_p0 }
  0x81   :  { %v17_v10 = vpop.permute.xlu0 %16  ;;  %v36_v12 = vpop.permute.xlu1 %35 }
  0x82   :  { %v23_v20 = vmul.f32 %v22_v14, %v17_v10  ;;  %v42_v22 = vmul.f32 %v41_v16, %v36_v12 }
  0x86   :  { %v26_v18 = vpop.permute.xlu0 %25  ;;  %v46_v19 = vpop.permute.xlu1 %45 }
  0x87   :  { %v32_v21 = vmul.f32 %v31_v15, %v26_v18  ;;  %v52_v24 = vmul.f32 %v51_v17, %v46_v19 }
  0x89   :  { %v33_v23 = vadd.f32 %v32_v21, %v23_v20 }
  0x8b   :  { %v43_v25 = vadd.f32 %v42_v22, %v33_v23 }
  0x8d   :  { %v257_v26 = vadd.f32 %v52_v24, %v43_v25 }
  0x8f   :  { %v57_v27 = vand.u32 2139095040, %v257_v26  ;;  %v54_v28 = vand.u32 2147483647, %v257_v26  ;;  %vm56_vm7 = vcmp.lt.s32.totalorder %v257_v26, 0  ;;  %vm146_vm12 = vweird.f32 %v257_v26 }
  0x91   :  { %v58_v29 = vshrl.u32 %v57_v27, 23  ;;  %v61_v31 = vand.u32 8388607, %v54_v28  ;;  %vm55_vm8 = vcmp.le.f32.partialorder %v54_v28, 0.7853982 }
  0x93   :  { %v173_v30 = vadd.s32 4294967169, %v58_v29  ;;  %v62_v34 = vor.u32 8388608, %v61_v31 }
  0x95   :  { %v64_v32 = vadd.s32 1, %v173_v30  ;;  %v102_v42 = vshll.u32 %v62_v34, 8 }
  0x97   :  { %vm65_vm0 = vcmp.gt.s32.totalorder %v64_v32, 0 }
  0x98   :  { %v66_v33 = vsel %vm65_vm0, %v64_v32, 0 }
  0x99   :  { %v68_v35 = vand.u32 31, %v66_v33  ;;  %v67_v36 = vshrl.u32 %v66_v33, 5 }
  0x9b   :  { %v69_v37 = vsub.s32 32, %v68_v35  ;;  %v80_v39 = vshll.u32 %v229_v38, %v68_v35  ;;  %v83_v41 = vshll.u32 %v230_v40, %v68_v35  ;;  %v71_v47 = vshll.u32 %v232_v46, %v68_v35 }
  0x9c   :  { %v74_v50 = vshll.u32 %v233_v48, %v68_v35  ;;  %v77_v53 = vshll.u32 %v234_v51, %v68_v35  ;;  %vm89_vm1 = vcmp.lt.s32.totalorder %v67_v36, 4  ;;  %vm86_vm2 = vcmp.lt.s32.totalorder %v67_v36, 1 }
  0x9d   :  { %v81_v43 = vshrl.u32 %v230_v40, %v69_v37  ;;  %v84_v45 = vshrl.u32 %v231_v44, %v69_v37  ;;  %v72_v49 = vshrl.u32 %v233_v48, %v69_v37  ;;  %v75_v52 = vshrl.u32 %v234_v51, %v69_v37 }
  0x9e   :  { %v78_v54 = vshrl.u32 %v229_v38, %v69_v37  ;;  %v70_v58 = vshrl.u32 %v232_v46, %v69_v37  ;;  %vm87_vm3 = vcmp.lt.s32.totalorder %v67_v36, 2  ;;  %vm88_vm4 = vcmp.lt.s32.totalorder %v67_v36, 3 }
  0x9f   :  { %v82_v55 = vor.u32 %v81_v43, %v80_v39  ;;  %v85_v56 = vor.u32 %v84_v45, %v83_v41  ;;  %v73_v57 = vor.u32 %v72_v49, %v71_v47  ;;  %v76_v59 = vor.u32 %v75_v52, %v74_v50 }
  0xa0   :  { %v79_v60 = vor.u32 %v78_v54, %v77_v53 }
  0xa1   :  { %v95_v61 = vsel %vm89_vm1, %v82_v55, 920167782  ;;  %v99_v62 = vsel %vm89_vm1, %v85_v56, 1326507024  ;;  %v94_v0 = vsel %vm86_vm2, %v73_v57, %v76_v59  ;;  %v90_v3 = vsel %vm86_vm2, %v70_v58, %v73_v57 }
  0xa2   :  { %v91_v63 = vsel %vm89_vm1, %v79_v60, 2102212464  ;;  %v96_v1 = vsel %vm88_vm4, %v79_v60, %v95_v61  ;;  %v98_v2 = vsel %vm86_vm2, %v76_v59, %v79_v60  ;;  %v100_v6 = vsel %vm88_vm4, %v82_v55, %v99_v62 }
  0xa3   :  { %v92_v4 = vsel %vm88_vm4, %v76_v59, %v91_v63  ;;  %v97_v5 = vsel %vm87_vm3, %v94_v0, %v96_v1  ;;  %v101_v7 = vsel %vm87_vm3, %v98_v2, %v100_v6 }
  0xa4   :  { %v263_v8 = vmul.u32.u64.low %v102_v42, %v97_v5  ;;  %v264_v9 = vmul.u32.u64.high %v102_v42, %v97_v5, %v263_v8  ;;  %v266_v10 = vmul.u32.u64.low %v102_v42, %v101_v7  ;;  %v267_v11 = vmul.u32.u64.high %v102_v42, %v101_v7, %v266_v10 }
  0xa5   :  { %v93_v12 = vsel %vm87_vm3, %v90_v3, %v92_v4 }
  0xa6   :  { %v112_v13 = vadd.s32 1, %v264_v9  ;;  %v109_v14 = vmul.u32 %v102_v42, %v93_v12  ;;  %vm111_vm5 = vc.u32 %v267_v11, %v263_v8  ;;  %v110_v27 = vadd.s32 %v263_v8, %v267_v11 }
  0xa8   :  { %v113_v15 = vsel %vm111_vm5, %v112_v13, %v264_v9 }
  0xa9   :  { %v114_v16 = vadd.s32 %v113_v15, %v109_v14 }
  0xab   :  { %v115_v17 = vadd.s32 536870912, %v114_v16 }
  0xad   :  { %v116_v18 = vshrl.u32 %v115_v17, 30 }
  0xaf   :  { %v117_v19 = vshll.u32 %v116_v18, 30  ;;  %v140_v40 = vsub.s32 4, %v116_v18 }
  0xb1   :  { %v118_v20 = vsub.s32 %v114_v16, %v117_v19  ;;  %v141_v43 = vsel %vm56_vm7, %v140_v40, %v116_v18 }
  0xb2   :  { %v143_v45 = vsel %vm55_vm8, 0, %v141_v43 }
  0xb3   :  { %v120_v21 = vsub.s32 0, %v118_v20  ;;  %v147_v46 = vadd.s32 3, %v143_v45 }
  0xb5   :  { %v174_v22 = vmin.u32 %v120_v21, %v118_v20  ;;  %v148_v47 = vand.u32 3, %v147_v46 }
  0xb7   :  { %v122_v23 = vclz %v174_v22  ;;  %vm153_vm9 = vcmp.eq.s32.totalorder %v148_v47, 2  ;;  %vm150_vm10 = vcmp.eq.s32.totalorder %v148_v47, 0  ;;  %vm149_vm11 = vcmp.lt.s32.totalorder %v148_v47, 2 }
  0xb9   :  { %v175_v24 = vadd.s32 4294967294, %v122_v23 }
  0xbb   :  { %vm176_vm6 = vcmp.lt.s32.totalorder %v175_v24, 0 }
  0xbc   :  { %v125_v25 = vsel %vm176_vm6, 0, %v175_v24 }
  0xbd   :  { %v126_v29 = vsub.s32 32, %v125_v25  ;;  %v130_v30 = vsub.s32 4294967266, %v125_v25  ;;  %v127_v31 = vshll.u32 %v118_v20, %v125_v25 }
  0xbf   :  { %v128_v32 = vshrl.u32 %v110_v27, %v126_v29  ;;  %v131_v33 = vadd.s32 127, %v130_v30 }
  0xc1   :  { %v129_v34 = vor.u32 %v128_v32, %v127_v31  ;;  %v132_v35 = vshll.u32 %v131_v33, 23 }
  0xc3   :  { %v133_v36 = vor.u32 4788187, %v132_v35  ;;  %v136_v38 = vcvt.s32.f32 %v129_v34 }
  0xc5   :  { %v134_v37 = vand.u32 2147483647, %v133_v36 }
  0xc7   :  { %v137_v39 = vmul.f32 %v136_v38, %v134_v37 }
  0xc9   :  { %v138_v41 = vxor.u32 2147483648, %v137_v39 }
  0xcb   :  { %v139_v42 = vsel %vm56_vm7, %v138_v41, %v137_v39 }
  0xcc   :  { %v142_v44 = vsel %vm55_vm8, %v257_v26, %v139_v42 }
  0xcd   :  { %197 = vcosq.f32 %v142_v44 }
  0xce   :  { %199 = vsinq.f32 %v142_v44 }
  0xd7   :  { %v198_v48 = vpop.eup %197 }
  0xd8   :  { %v200_v49 = vpop.eup %199  ;;  %v154_v50 = vxor.u32 2147483648, %v198_v48 }
  0xd9   :  { %v151_v51 = vxor.u32 2147483648, %v200_v49 }
  0xda   :  { %v155_v52 = vsel %vm153_vm9, %v154_v50, %v200_v49 }
  0xdb   :  { %v152_v28 = vsel %vm150_vm10, %v198_v48, %v151_v51 }
  0xdc   :  { %v156_v53 = vsel %vm149_vm11, %v152_v28, %v155_v52 }
  0xdd   :  { %v157_v54 = vsel %vm146_vm12, nan, %v156_v53 }
  0xde   :  { %158 = vst [vmem:[#allocation2] sm:$0xff] %v157_v54 }
  0xdf   :  { %212 = shalt.err (!%p209_p4)
}
  0xe0   :  { %s213_s16 = scalar_lea.hbm %s292_s2, 128 }
  0xe1   :  { %p214_p5 = scmp.ne.s32.totalorder %s292_s2, %s213_s16  ;;  %p217_p6 = scmp.lt.u32.totalorder %s213_s16, %s292_s2 }
  0xe3   :  { %p219_p7 = pnand %p217_p6, %p214_p5 }
  0xe5   :  { %222 = shalt.err (!%p219_p7)
}
  0xe6   :  { %168 = dma.vmem_to_hbm [thread:$0]  %s166_s12, 128, %s292_s2, [#allocation3]  }
  0xe7   :  { %223 = dma.done.wait [#allocation3], 128  }
  0xe8   :  { %224 = vsyncadd [#allocation3], 4294967168 }
  0xe9   :  { %172 = vsyncpa [#allocation3], 1 }

</bundles_post_ra>
